<compile_context>
chip_gen: v7x
topology: tpu7x:2x2x1
jax: 0.10.0
libtpu: 0.0.40
codegen_flags: <defaults>
</compile_context>

<pallas_src>
import jax
import jax.numpy as jnp
from jax.experimental import pallas as pl
from jax.experimental.pallas import tpu as pltpu


def _identity_copy_kernel(x_ref, o_ref):
    # Pure vld -> vst stream; no reshape inside the kernel (avoids XLU relayout).
    o_ref[...] = x_ref[...]


# Below this many bytes the fixed pallas_call dispatch + per-step overhead
# dwarfs the copy, so the free metadata reshape is always used.
_SMALL_BYTES_THRESHOLD = 1 << 20  # 1 MiB


def _per_buffer_budget_bytes() -> int:
    """Per-VMEM-buffer budget for the copy tiles.

    2 input + 2 output double-buffers must stay comfortably under the scoped
    VMEM default on every generation (v5e 16 MiB, v6e 32 MiB, v7x 32 MiB scoped
    / 64 MiB physical).  3 MiB/buffer -> 12 MiB total on v5e/v6e; on v7x the
    hardware query clamps it to ~2 MiB/buffer -> 8 MiB total.
    """
    default = 3 * 1024 * 1024
    try:
        vmem = pltpu.get_tpu_info().vmem_capacity_bytes
        return max(512 * 1024, min(default, vmem // 32))
    except Exception:  # pragma: no cover - info query unavailable
        return default


def unflatten(x: jax.Array, channel_number: int, use_kernel: bool | None = None) -> jax.Array:
    """Pallas equivalent of UnFlatten(channel_number)(x).

    Accepts x of shape (B, ...); flattens trailing dims (zero-cost) and returns
    (B, channel_number, -1), matching torch .view(B, C, -1) semantics.

    use_kernel:
      None  -> auto: plain reshape for small inputs, Pallas copy otherwise.
      False -> always plain (free) reshape.
      True  -> always route through the Pallas identity-copy kernel.
    """
    B = x.shape[0]
    x2d = x.reshape(B, -1)  # free metadata reshape in XLA
    N = x2d.shape[1]
    C = channel_number
    assert N % C == 0, "feature dim must be divisible by channel_number"
    L = N // C

    itemsize = jnp.dtype(x2d.dtype).itemsize
    total_bytes = B * N * itemsize

    if use_kernel is None:
        use_kernel = total_bytes >= _SMALL_BYTES_THRESHOLD
    if not use_kernel:
        # Zero-cost path: the view reshape is pure metadata.
        return x2d.reshape(B, C, L)

    # --- Tiling for the identity-copy fusion point ---------------------------
    # Sublane packing rows per 32-bit slot: f32 -> 8, bf16 -> 16, int8/fp8 -> 32.
    packing = max(8, 32 // itemsize)
    budget = _per_buffer_budget_bytes()

    # N (lane) axis: tile in multiples of 128 so stores stay lane-dense and
    # unmasked; only possible when N itself is a multiple of 128.
    if N % 128 == 0:
        n_fit = max(128, (budget // (packing * itemsize)) // 128 * 128)
        n_tile = min(N, n_fit)
        # Prefer an n_tile that divides N (no masked tail block on the lane axis).
        while N % n_tile != 0:
            n_tile -= 128
    else:
        # Cannot tile a non-128-multiple lane dim; full extent is still correct.
        n_tile = N

    # Row (sublane) axis.
    rows_fit = max(1, budget // max(1, n_tile * itemsize))
    if rows_fit >= B:
        if B >= 2 * packing:
            # Whole array fits one block, but split into >= 2 grid steps so the
            # "parallel" axis has work for both v7x TensorCores.
            half = -(-B // 2)                      # ceil(B / 2)
            tile_rows = -(-half // packing) * packing
        else:
            tile_rows = B                          # full dim -> legal block shape
    else:
        tile_rows = max(packing, (rows_fit // packing) * packing)
        # Prefer a tile_rows that divides B so the last grid step isn't partial.
        for cand in range(tile_rows, packing - 1, -packing):
            if B % cand == 0:
                tile_rows = cand
                break
    tile_rows = min(tile_rows, B)

    grid = (pl.cdiv(B, tile_rows), pl.cdiv(N, n_tile))

    y2d = pl.pallas_call(
        _identity_copy_kernel,
        out_shape=jax.ShapeDtypeStruct((B, N), x2d.dtype),
        grid=grid,
        in_specs=[pl.BlockSpec((tile_rows, n_tile), lambda i, j: (i, j))],
        out_specs=pl.BlockSpec((tile_rows, n_tile), lambda i, j: (i, j)),
        input_output_aliases={0: 0},  # alias the (B, N) buffer instead of duplicating it
        cost_estimate=pl.CostEstimate(
            flops=0, transcendentals=0, bytes_accessed=2 * total_bytes),
        compiler_params=pltpu.CompilerParams(
            dimension_semantics=("parallel", "parallel"),
        ),
    )(x2d)

    # The (B, N) -> (B, C, L) reshape is a free view outside the kernel.
    return y2d.reshape(B, C, L)


if __name__ == "__main__":
    key = jax.random.PRNGKey(0)

    # Shapes consistent with the VAE usage: batch=2, channel_number=4 over a
    # (2, 4, 16, 16) activation  ->  output (2, 4, 256).
    B, C, H, W = 2, 4, 16, 16
    x = jax.random.normal(key, (B, C, H, W), dtype=jnp.float32)

    # Auto path (small input -> free metadata reshape, no kernel launch).
    y_fast = unflatten(x, channel_number=C)
    # Forced kernel path, to exercise the Pallas identity copy at this shape.
    y_kern = unflatten(x, channel_number=C, use_kernel=True)
    y_fast, y_kern = jax.block_until_ready((y_fast, y_kern))

    # Reference check against plain-JAX reshape (== torch .view semantics).
    y_ref = x.reshape(B, C, -1)
    assert y_fast.shape == (B, C, H * W) and y_kern.shape == (B, C, H * W)
    assert y_fast.dtype == x.dtype and y_kern.dtype == x.dtype
    assert jnp.array_equal(y_fast, y_ref)
    assert jnp.array_equal(y_kern, y_ref)

    print("KERNEL_OK")
</pallas_src>

<mosaic_0001>
module attributes {stable_mosaic.version = 11 : i64} {
  func.func @_identity_copy_kernel(%arg0: i32, %arg1: i32, %arg2: memref<2x1024xf32, #tpu.memory_space<vmem>>, %arg3: memref<2x1024xf32, #tpu.memory_space<vmem>>) attributes {dimension_semantics = [#tpu.dimension_semantics<parallel>, #tpu.dimension_semantics<parallel>], iteration_bounds = array<i64: 1, 1>, scalar_prefetch = 0 : i64, scratch_operands = 0 : i64, tpu.core_type = #tpu.core_type<tc>, window_params = [{transform_indices = @transform_0, window_bounds = array<i64: 2, 1024>}, {transform_indices = @transform_1, window_bounds = array<i64: 2, 1024>}]} {
    %c0 = arith.constant 0 : index
    %c0_0 = arith.constant 0 : index
    %0 = vector.load %arg2[%c0, %c0_0] : memref<2x1024xf32, #tpu.memory_space<vmem>>, vector<2x1024xf32>
    %c0_1 = arith.constant 0 : index
    %c0_2 = arith.constant 0 : index
    %1 = vector.load %arg3[%c0_1, %c0_2] : memref<2x1024xf32, #tpu.memory_space<vmem>>, vector<2x1024xf32>
    tpu.vector_store %arg3[%c0_1, %c0_2], %0 {strides = array<i32>} : memref<2x1024xf32, #tpu.memory_space<vmem>>, vector<2x1024xf32>,
    return
  }
  func.func @transform_0(%arg0: i32, %arg1: i32) -> (i32, i32) {
    %c0_i32 = arith.constant 0 : i32
    return %arg0, %arg1 : i32, i32
  }
  func.func @transform_1(%arg0: i32, %arg1: i32) -> (i32, i32) {
    %c0_i32 = arith.constant 0 : i32
    return %arg0, %arg1 : i32, i32
  }
}

</mosaic_0001>

<bundles_post_ra>
// kernel: tpu_custom_call.1
= control target key start
LH: loop header
LB: loop body
LE: loop exit
PB: predicated region body
PF: predicated region fallthrough
CT: control target
= control target key end

     0   :  { %6 = vsyncpa [#allocation3], 0  ;;  %s126_s0 = inlined_call_operand.hbm [shape: f32[2,1024], index: 0, kind: input, shape index: {}, may-alias: {0,1}]   ;;  %s127_s1 = inlined_call_operand.hbm [shape: f32[2,1024], index: 1, kind: output, shape index: {}, may-alias: {0,1}]  }
   0x1   :  { %7 = vsyncpa [#allocation4], 0  ;;  %s90_s6 = smov [#allocation2]   ;;  %s42_s10 = scalar_lea.hbm %s126_s0, 256 }
   0x2   :  { %s14_s7 = sshll.u32 %s90_s6, 4  ;;  %p43_p0 = scmp.ne.s32.totalorder %s126_s0, %s42_s10  ;;  %s15_s7 = int_to_ptr.vmem [resolvable:$true] %s14_s7 }
   0x3   :  { %p46_p1 = scmp.lt.u32.totalorder %s42_s10, %s126_s0 }
   0x5   :  { %p48_p2 = pnand %p46_p1, %p43_p0 }
   0x7   :  { %51 = shalt.err (!%p48_p2)
}
   0x8   :  { %s52_s15 = scalar_lea.vmem %s15_s7, 256  ;;  %p57_p4 = scmp.lt.s32.totalorder %s15_s7, %s15_s7 }
   0x9   :  { %p53_p3 = scmp.ne.s32.totalorder %s15_s7, %s52_s15  ;;  %p58_p5 = scmp.lt.s32.totalorder %s52_s15, %s52_s15 }
   0xb   :  { %p59_p6 = por %p58_p5, %p57_p4 }
   0xd   :  { %p60_p7 = pnand %p59_p6, %p53_p3 }
   0xf   :  { %63 = shalt.err (!%p60_p7)
}
  0x10   :  { %17 = dma.hbm_to_vmem [thread:$0]  %s126_s0, 256, %s15_s7, [#allocation3]  }
  0x11   :  { %86 = dma.done.wait [#allocation3], 256  }
  0x12   :  { %87 = vsyncadd [#allocation3], 4294967040  ;;  %s91_s18 = smov [#allocation5]   ;;  %v21_v0 = vld [vmem:[#allocation2] sm:$0xff]  ;;  %v22_v1 = vld [vmem:[#allocation2 + $0x8] sm:$0xff] }
  0x13   :  { %s31_s19 = sshll.u32 %s91_s18, 4  ;;  %23 = vst [vmem:[#allocation5] sm:$0xff] %v21_v0  ;;  %24 = vst [vmem:[#allocation5 + $0x8] sm:$0xff] %v22_v1  ;;  %s32_s19 = int_to_ptr.vmem [resolvable:$true] %s31_s19 }
  0x14   :  { %s64_s20 = scalar_lea.vmem %s32_s19, 256  ;;  %p69_p9 = scmp.lt.s32.totalorder %s32_s19, %s32_s19 }
  0x15   :  { %p65_p8 = scmp.ne.s32.totalorder %s32_s19, %s64_s20  ;;  %p70_p10 = scmp.lt.s32.totalorder %s64_s20, %s64_s20 }
  0x17   :  { %p71_p11 = por %p70_p10, %p69_p9 }
  0x19   :  { %p72_p12 = pnand %p71_p11, %p65_p8 }
  0x1b   :  { %75 = shalt.err (!%p72_p12)
}
  0x1c   :  { %s76_s0 = scalar_lea.hbm %s127_s1, 256 }
  0x1d   :  { %p77_p13 = scmp.ne.s32.totalorder %s127_s1, %s76_s0  ;;  %p80_p0 = scmp.lt.u32.totalorder %s76_s0, %s127_s1 }
  0x1f   :  { %p82_p1 = pnand %p80_p0, %p77_p13 }
  0x21   :  { %85 = shalt.err (!%p82_p1)
}
  0x22   :  { %34 = dma.vmem_to_hbm [thread:$0]  %s32_s19, 256, %s127_s1, [#allocation4]  }
  0x23   :  { %88 = dma.done.wait [#allocation4], 256  }
  0x24   :  { %89 = vsyncadd [#allocation4], 4294967040 }
  0x25   :  { %38 = vsyncpa [#allocation3], 1 }
  0x26   :  { %39 = vsyncpa [#allocation4], 1 }

</bundles_post_ra>
